<compile_context>
chip_gen: v5e
topology: v5e:2x2
jax: 0.10.0
libtpu: 0.0.40
codegen_flags: <defaults>
</compile_context>

<pallas_src>
import math

import jax
import jax.numpy as jnp
from jax import lax
from jax.experimental import pallas as pl
from jax.experimental.pallas import tpu as pltpu


def _round_up(x, m):
    return (x + m - 1) // m * m


def _critic_kernel(xs_ref, xa_ref, w1s_ref, w1a_ref, b1_ref,
                   w2_ref, b2_ref, w3r_ref, b3_ref, o_ref):
    # ----- Layer 1: Linear(feat -> 64) + ReLU (dropout = identity) ---------
    # Split matmul over the (state | action) feature halves avoids any HBM
    # concat; f32 accumulation regardless of streamed dtype.
    h1 = (jnp.dot(xs_ref[...], w1s_ref[...], preferred_element_type=jnp.float32)
          + jnp.dot(xa_ref[...], w1a_ref[...], preferred_element_type=jnp.float32)
          + b1_ref[...])
    h1 = jnp.maximum(h1, 0.0)                                    # (TB, 64) f32

    # ----- Layer 2: Linear(64 -> 32) + ReLU ---------------------------------
    h2 = jnp.dot(h1.astype(w2_ref.dtype), w2_ref[...],
                 preferred_element_type=jnp.float32) + b2_ref[...]
    h2 = jnp.maximum(h2, 0.0)                                    # (TB, 32) f32

    # ----- Layer 3 (32 -> 1) + trailing ReLU, emitted LANE-DENSE ------------
    # Contract h2's last dim against the W3 row so the Q-values come out as a
    # (1, TB) row (batch on the lane axis) -> full-width store, no vst.msk.
    q = lax.dot_general(w3r_ref[...].astype(jnp.float32), h2,
                        (((1,), (1,)), ((), ())),
                        preferred_element_type=jnp.float32)      # (1, TB)
    q = jnp.maximum(q + b3_ref[0, 0], 0.0)                       # trailing ReLU per spec
    o_ref[...] = q.reshape(o_ref.shape)


def ddpg_critic_forward(state, actions, params, *, block_b=1024):
    """state: (B, S, Ds), actions: (B, S, Da) -> (B, 1) float32 Q-values."""
    w1, b1, w2, b2, w3, b3 = params
    B, S, Ds = state.shape
    _, _, Da = actions.shape
    feat = S * (Ds + Da)
    assert w1.shape == (feat, 64), w1.shape

    # Stream activations in their native dtype (no wrapper-side HBM cast pass);
    # weights are cast once (tiny) to match.  Contiguous reshapes are free.
    cdt = state.dtype
    xs = state.reshape(B, S * Ds)
    xa = actions.reshape(B, S * Da)
    if xa.dtype != cdt:
        xa = xa.astype(cdt)

    # Split W1's interleaved rows (per timestep: [Ds state | Da action]) once.
    w1r = w1.reshape(S, Ds + Da, 64)
    w1s = w1r[:, :Ds, :].reshape(S * Ds, 64).astype(cdt)
    w1a = w1r[:, Ds:, :].reshape(S * Da, 64).astype(cdt)
    w2c = w2.astype(cdt)
    w3_row = w3.reshape(1, 32).astype(cdt)             # row layout for the Q head
    b1f = b1.reshape(1, 64).astype(jnp.float32)
    b2f = b2.reshape(1, 32).astype(jnp.float32)
    b3f = b3.reshape(1, 1).astype(jnp.float32)          # SMEM scalar

    # ---- Batch tile size ----------------------------------------------------
    itemsize = jnp.dtype(cdt).itemsize
    # Double-buffered xs+xa tiles cost ~ 2 buffers * 2 operands * tb * feat * itemsize;
    # keep under a 16 MiB budget (safe for v7x's 32 MiB scoped-VMEM default, leaves
    # headroom for weights/output on v5e/v6e too).
    vmem_budget = 16 * 1024 * 1024
    tb_cap = max(8, (vmem_budget // max(4 * feat * itemsize, 1)) // 8 * 8)
    block_b = max(8, (block_b // 8) * 8)
    if B <= 8:
        tb = B            # single full-extent block (exact dims, no ragged edge)
    else:
        # >=2 grid steps so the "parallel" batch axis shards across both v7x
        # TensorCores; 8-aligned tiles, NO wrapper-side padding: Pallas masks the
        # ragged last block and rows are independent, so pad rows never feed real
        # outputs.
        tb = min(block_b, _round_up(pl.cdiv(B, 2), 8), tb_cap)
    nt = pl.cdiv(B, tb)

    fs, fa = S * Ds, S * Da
    const = lambda i: (0, 0)    # weights/biases: DMA'd once, VMEM-resident across tiles

    cost = pl.CostEstimate(
        flops=2 * B * (feat * 64 + 64 * 32 + 32),
        transcendentals=0,
        bytes_accessed=(B * feat * itemsize                       # streamed activations
                        + (feat * 64 + 64 * 32 + 32) * itemsize   # weights
                        + (64 + 32 + 1) * 4                       # biases
                        + nt * tb * 4))                           # output slab

    out = pl.pallas_call(
        _critic_kernel,
        out_shape=jax.ShapeDtypeStruct((nt, 1, tb), jnp.float32),
        grid=(nt,),
        in_specs=[
            pl.BlockSpec((tb, fs), lambda i: (i, 0)),              # xs tile (streamed)
            pl.BlockSpec((tb, fa), lambda i: (i, 0)),              # xa tile (streamed)
            pl.BlockSpec((fs, 64), const),                         # W1 (state half)
            pl.BlockSpec((fa, 64), const),                         # W1 (action half)
            pl.BlockSpec((1, 64), const),                          # b1
            pl.BlockSpec((64, 32), const),                         # W2
            pl.BlockSpec((1, 32), const),                          # b2
            pl.BlockSpec((1, 32), const),                          # W3 as a row
            pl.BlockSpec(memory_space=pltpu.MemorySpace.SMEM),     # b3 scalar in SMEM
        ],
        out_specs=pl.BlockSpec((1, 1, tb), lambda i: (i, 0, 0)),   # lane-dense slab
        compiler_params=pltpu.CompilerParams(
            dimension_semantics=("parallel",)),
        cost_estimate=cost,
    )(xs, xa, w1s, w1a, b1f, w2c, b2f, w3_row, b3f)

    # (nt, 1, tb) slab -> (B, 1); the trim touches only a B-element array.
    return out.reshape(nt * tb)[:B].reshape(B, 1)


def init_params(key, input_dims):
    """Deterministic init mimicking PyTorch nn.Linear default (U[-1/sqrt(fan_in), +])."""
    dims = [(input_dims, 64), (64, 32), (32, 1)]
    params = []
    for fan_in, fan_out in dims:
        kw, kb, key = jax.random.split(key, 3)
        bound = 1.0 / math.sqrt(fan_in)
        w = jax.random.uniform(kw, (fan_in, fan_out), jnp.float32, -bound, bound)
        bvec = jax.random.uniform(kb, (1, fan_out), jnp.float32, -bound, bound)
        params += [w, bvec]
    return tuple(params)


def _reference(state, actions, params):
    """Pure-JAX reference matching the PyTorch forward (eval-mode dropout)."""
    w1, b1, w2, b2, w3, b3 = params
    b = state.shape[0]
    x = jnp.concatenate([state, actions], axis=2).reshape(b, -1)
    h1 = jnp.maximum(x @ w1 + b1.reshape(1, -1), 0.0)
    h2 = jnp.maximum(h1 @ w2 + b2.reshape(1, -1), 0.0)
    return jnp.maximum(h2 @ w3 + b3.reshape(1, -1), 0.0)


if __name__ == "__main__":
    # Shapes consistent with the module: state (B, S, Ds), actions (B, S, Da).
    B, S, Ds, Da = 2, 8, 3, 1
    input_dims = S * (Ds + Da)          # 32 -> nn.Linear(in_features=32, out_features=64)

    key = jax.random.PRNGKey(0)
    k_state, k_act, k_param = jax.random.split(key, 3)
    state = jax.random.normal(k_state, (B, S, Ds), jnp.float32)
    actions = jax.random.normal(k_act, (B, S, Da), jnp.float32)
    params = init_params(k_param, input_dims)

    out = ddpg_critic_forward(state, actions, params)
    out = jax.block_until_ready(out)
    assert out.shape == (B, 1), out.shape
    assert out.dtype == jnp.float32

    ref = _reference(state, actions, params)
    assert jnp.allclose(out, ref, rtol=1e-5, atol=1e-5), (out, ref)
    print("KERNEL_OK")
</pallas_src>

<mosaic_0001>
module attributes {stable_mosaic.version = 11 : i64} {
  func.func @_critic_kernel(%arg0: i32, %arg1: memref<2x24xf32, #tpu.memory_space<vmem>>, %arg2: memref<2x8xf32, #tpu.memory_space<vmem>>, %arg3: memref<24x64xf32, #tpu.memory_space<vmem>>, %arg4: memref<8x64xf32, #tpu.memory_space<vmem>>, %arg5: memref<1x64xf32, #tpu.memory_space<vmem>>, %arg6: memref<64x32xf32, #tpu.memory_space<vmem>>, %arg7: memref<1x32xf32, #tpu.memory_space<vmem>>, %arg8: memref<1x32xf32, #tpu.memory_space<vmem>>, %arg9: memref<1x1xf32, #tpu.memory_space<smem>>, %arg10: memref<1x1x2xf32, #tpu.memory_space<vmem>>) attributes {dimension_semantics = [#tpu.dimension_semantics<parallel>], iteration_bounds = array<i64: 1>, scalar_prefetch = 0 : i64, scratch_operands = 0 : i64, tpu.core_type = #tpu.core_type<tc>, window_params = [{transform_indices = @transform_0, window_bounds = array<i64: 2, 24>}, {transform_indices = @transform_1, window_bounds = array<i64: 2, 8>}, {pipeline_mode = #tpu.pipeline_mode<synchronous>, transform_indices = @transform_2, window_bounds = array<i64: 24, 64>}, {pipeline_mode = #tpu.pipeline_mode<synchronous>, transform_indices = @transform_3, window_bounds = array<i64: 8, 64>}, {pipeline_mode = #tpu.pipeline_mode<synchronous>, transform_indices = @transform_4, window_bounds = array<i64: 1, 64>}, {pipeline_mode = #tpu.pipeline_mode<synchronous>, transform_indices = @transform_5, window_bounds = array<i64: 64, 32>}, {pipeline_mode = #tpu.pipeline_mode<synchronous>, transform_indices = @transform_6, window_bounds = array<i64: 1, 32>}, {pipeline_mode = #tpu.pipeline_mode<synchronous>, transform_indices = @transform_7, window_bounds = array<i64: 1, 32>}, {transform_indices = @transform_8, window_bounds = array<i64: 1, 1>}, {transform_indices = @transform_9, window_bounds = array<i64: 1, 1, 2>}]} {
    %c0 = arith.constant 0 : index
    %c0_0 = arith.constant 0 : index
    %0 = vector.load %arg1[%c0, %c0_0] : memref<2x24xf32, #tpu.memory_space<vmem>>, vector<2x24xf32>
    %c0_1 = arith.constant 0 : index
    %c0_2 = arith.constant 0 : index
    %1 = vector.load %arg3[%c0_1, %c0_2] : memref<24x64xf32, #tpu.memory_space<vmem>>, vector<24x64xf32>
    %cst = arith.constant dense<0.000000e+00> : vector<2x64xf32>
    %2 = tpu.matmul %0, %1, %cst {dimension_numbers = #tpu.dot_dimension_numbers<[1], [0], [0], [1], [0, 0, 1, 1], [], []>} : vector<2x24xf32>, vector<24x64xf32>, vector<2x64xf32> -> vector<2x64xf32>
    %c0_3 = arith.constant 0 : index
    %c0_4 = arith.constant 0 : index
    %3 = vector.load %arg2[%c0_3, %c0_4] : memref<2x8xf32, #tpu.memory_space<vmem>>, vector<2x8xf32>
    %c0_5 = arith.constant 0 : index
    %c0_6 = arith.constant 0 : index
    %4 = vector.load %arg4[%c0_5, %c0_6] : memref<8x64xf32, #tpu.memory_space<vmem>>, vector<8x64xf32>
    %cst_7 = arith.constant dense<0.000000e+00> : vector<2x64xf32>
    %5 = tpu.matmul %3, %4, %cst_7 {dimension_numbers = #tpu.dot_dimension_numbers<[1], [0], [0], [1], [0, 0, 1, 1], [], []>} : vector<2x8xf32>, vector<8x64xf32>, vector<2x64xf32> -> vector<2x64xf32>
    %6 = arith.addf %2, %5 : vector<2x64xf32>
    %c0_8 = arith.constant 0 : index
    %c0_9 = arith.constant 0 : index
    %7 = vector.load %arg5[%c0_8, %c0_9] : memref<1x64xf32, #tpu.memory_space<vmem>>, vector<1x64xf32>
    %8 = vector.broadcast %7 : vector<1x64xf32> to vector<2x64xf32>
    %9 = arith.addf %6, %8 : vector<2x64xf32>
    %cst_10 = arith.constant 0.000000e+00 : f32
    %10 = vector.broadcast %cst_10 : f32 to vector<2x64xf32>
    %11 = arith.maximumf %9, %10 : vector<2x64xf32>
    %c0_11 = arith.constant 0 : index
    %c0_12 = arith.constant 0 : index
    %12 = vector.load %arg6[%c0_11, %c0_12] : memref<64x32xf32, #tpu.memory_space<vmem>>, vector<64x32xf32>
    %cst_13 = arith.constant dense<0.000000e+00> : vector<2x32xf32>
    %13 = tpu.matmul %11, %12, %cst_13 {dimension_numbers = #tpu.dot_dimension_numbers<[1], [0], [0], [1], [0, 0, 1, 1], [], []>} : vector<2x64xf32>, vector<64x32xf32>, vector<2x32xf32> -> vector<2x32xf32>
    %c0_14 = arith.constant 0 : index
    %c0_15 = arith.constant 0 : index
    %14 = vector.load %arg7[%c0_14, %c0_15] : memref<1x32xf32, #tpu.memory_space<vmem>>, vector<1x32xf32>
    %15 = vector.broadcast %14 : vector<1x32xf32> to vector<2x32xf32>
    %16 = arith.addf %13, %15 : vector<2x32xf32>
    %cst_16 = arith.constant 0.000000e+00 : f32
    %17 = vector.broadcast %cst_16 : f32 to vector<2x32xf32>
    %18 = arith.maximumf %16, %17 : vector<2x32xf32>
    %c0_17 = arith.constant 0 : index
    %c0_18 = arith.constant 0 : index
    %19 = vector.load %arg8[%c0_17, %c0_18] : memref<1x32xf32, #tpu.memory_space<vmem>>, vector<1x32xf32>
    %cst_19 = arith.constant dense<0.000000e+00> : vector<1x2xf32>
    %20 = tpu.matmul %19, %18, %cst_19 {dimension_numbers = #tpu.dot_dimension_numbers<[1], [1], [0], [0], [0, 0, 1, 0], [], []>} : vector<1x32xf32>, vector<2x32xf32>, vector<1x2xf32> -> vector<1x2xf32>
    %c0_20 = arith.constant 0 : index
    %c0_21 = arith.constant 0 : index
    %21 = memref.load %arg9[%c0_20, %c0_21] : memref<1x1xf32, #tpu.memory_space<smem>>
    %22 = vector.broadcast %21 : f32 to vector<1x2xf32>
    %23 = arith.addf %20, %22 : vector<1x2xf32>
    %cst_22 = arith.constant 0.000000e+00 : f32
    %24 = vector.broadcast %cst_22 : f32 to vector<1x2xf32>
    %25 = arith.maximumf %23, %24 : vector<1x2xf32>
    %26 = vector.shape_cast %25 : vector<1x2xf32> to vector<1x1x2xf32>
    %c0_23 = arith.constant 0 : index
    %c0_24 = arith.constant 0 : index
    %c0_25 = arith.constant 0 : index
    %27 = vector.load %arg10[%c0_23, %c0_24, %c0_25] : memref<1x1x2xf32, #tpu.memory_space<vmem>>, vector<1x1x2xf32>
    tpu.vector_store %arg10[%c0_23, %c0_24, %c0_25], %26 {strides = array<i32>} : memref<1x1x2xf32, #tpu.memory_space<vmem>>, vector<1x1x2xf32>,
    return
  }
  func.func @transform_0(%arg0: i32) -> (i32, i32) {
    %c0_i32 = arith.constant 0 : i32
    %c0_i32_0 = arith.constant 0 : i32
    return %arg0, %c0_i32 : i32, i32
  }
  func.func @transform_1(%arg0: i32) -> (i32, i32) {
    %c0_i32 = arith.constant 0 : i32
    %c0_i32_0 = arith.constant 0 : i32
    return %arg0, %c0_i32 : i32, i32
  }
  func.func @transform_2(%arg0: i32) -> (i32, i32) {
    %c0_i32 = arith.constant 0 : i32
    %c0_i32_0 = arith.constant 0 : i32
    %c0_i32_1 = arith.constant 0 : i32
    return %c0_i32, %c0_i32_0 : i32, i32
  }
  func.func @transform_3(%arg0: i32) -> (i32, i32) {
    %c0_i32 = arith.constant 0 : i32
    %c0_i32_0 = arith.constant 0 : i32
    %c0_i32_1 = arith.constant 0 : i32
    return %c0_i32, %c0_i32_0 : i32, i32
  }
  func.func @transform_4(%arg0: i32) -> (i32, i32) {
    %c0_i32 = arith.constant 0 : i32
    %c0_i32_0 = arith.constant 0 : i32
    %c0_i32_1 = arith.constant 0 : i32
    return %c0_i32, %c0_i32_0 : i32, i32
  }
  func.func @transform_5(%arg0: i32) -> (i32, i32) {
    %c0_i32 = arith.constant 0 : i32
    %c0_i32_0 = arith.constant 0 : i32
    %c0_i32_1 = arith.constant 0 : i32
    return %c0_i32, %c0_i32_0 : i32, i32
  }
  func.func @transform_6(%arg0: i32) -> (i32, i32) {
    %c0_i32 = arith.constant 0 : i32
    %c0_i32_0 = arith.constant 0 : i32
    %c0_i32_1 = arith.constant 0 : i32
    return %c0_i32, %c0_i32_0 : i32, i32
  }
  func.func @transform_7(%arg0: i32) -> (i32, i32) {
    %c0_i32 = arith.constant 0 : i32
    %c0_i32_0 = arith.constant 0 : i32
    %c0_i32_1 = arith.constant 0 : i32
    return %c0_i32, %c0_i32_0 : i32, i32
  }
  func.func @transform_8(%arg0: i32) -> (i32, i32) {
    %c0_i32 = arith.constant 0 : i32
    %c0_i32_0 = arith.constant 0 : i32
    %c0_i32_1 = arith.constant 0 : i32
    return %c0_i32, %c0_i32_0 : i32, i32
  }
  func.func @transform_9(%arg0: i32) -> (i32, i32, i32) {
    %c0_i32 = arith.constant 0 : i32
    %c0_i32_0 = arith.constant 0 : i32
    %c0_i32_1 = arith.constant 0 : i32
    return %arg0, %c0_i32, %c0_i32_0 : i32, i32, i32
  }
}

</mosaic_0001>

<bundles_post_ra>
// kernel: tpu_custom_call.1
= control target key start
LH: loop header
LB: loop body
LE: loop exit
PB: predicated region body
PF: predicated region fallthrough
CT: control target
= control target key end

     0   :  { %vm40_vm0 = vcmask 64512   ;;  %vm64_vm1 = vcmask 195584   ;;  %s322_s0 = inlined_call_operand.vmem [shape: f32[2,24], index: 0, kind: input, shape index: {}]   ;;  %s323_s1 = inlined_call_operand.vmem [shape: f32[2,8], index: 1, kind: input, shape index: {}]   ;;  %s324_s2 = inlined_call_operand.vmem [shape: f32[24,64], index: 2, kind: input, shape index: {}]   ;;  %s325_s3 = inlined_call_operand.vmem [shape: f32[8,64], index: 3, kind: input, shape index: {}]   ;;  %s326_s4 = inlined_call_operand.vmem [shape: f32[1,64], index: 4, kind: input, shape index: {}]   ;;  %s327_s5 = inlined_call_operand.vmem [shape: f32[64,32], index: 5, kind: input, shape index: {}]   ;;  %s328_s6 = inlined_call_operand.vmem [shape: f32[1,32], index: 6, kind: input, shape index: {}]   ;;  %s329_s7 = inlined_call_operand.vmem [shape: f32[1,32], index: 7, kind: input, shape index: {}]   ;;  %s330_s8 = inlined_call_operand.<no memory space> [shape: f32[1,1], index: 8, kind: input, shape index: {}]   ;;  %s331_s9 = inlined_call_operand.hbm [shape: f32[1,1,2], index: 9, kind: output, shape index: {}]  }
   0x1   :  { %v37_v0 = vld [vmem:[%s324_s2 + $0x10] sm:$0xff]  ;;  %v36_v1 = vld [vmem:[%s324_s2 + $0x8] sm:$0xff]  ;;  %v39_v2 = vld [vmem:[%s325_s3] sm:$0xff] }
   0x2   :  { %81 = vmatpush.msra.mxu1 %v37_v0  ;;  %59 = vmatpush.msra.mxu0 %v39_v2  ;;  %v38_v3 = vld [vmem:[%s323_s1] sm:$0x3]  ;;  %v101_v5 = vld [vmem:[%s327_s5 + $0x38] sm:$0xff]  ;;  %v100_v6 = vld [vmem:[%s327_s5 + $0x30] sm:$0xff] }
   0x3   :  { %v35_v4 = vld [vmem:[%s324_s2] sm:$0xff]  ;;  %180 = vmatmul.msk.f32.vlgmr.msra.gmra.mxu0 %vm40_vm0, %v38_v3  ;;  %118 = vmatpush.msra.mxu2 %v101_v5  ;;  %v99_v8 = vld [vmem:[%s327_s5 + $0x28] sm:$0xff] }
   0x4   :  { %82 = vmatpush.msra.mxu1 %v36_v1  ;;  %v34_v7 = vld [vmem:[%s322_s0] sm:$0x3] }
   0x5   :  { %15 = vsyncpa [#allocation4], 0  ;;  %119 = vmatpush.msra.mxu2 %v100_v6  ;;  %v98_v9 = vld [vmem:[%s327_s5 + $0x20] sm:$0xff]  ;;  %v97_v10 = vld [vmem:[%s327_s5 + $0x18] sm:$0xff]  ;;  %vm106_vm2 = vcmask 523264   ;;  %vm134_vm3 = vcmask 261120   ;;  %v133_v25 = vstv %s330_s8 }
   0x6   :  { %83 = vmatpush.msra.mxu1 %v35_v4  ;;  %v96_v11 = vld [vmem:[%s327_s5 + $0x10] sm:$0xff]  ;;  %v95_v12 = vld [vmem:[%s327_s5 + $0x8] sm:$0xff]  ;;  %v94_v13 = vld [vmem:[%s327_s5] sm:$0xff]  ;;  %s214_s18 = smov [#allocation3]   ;;  %vm162_vm4 = vcmask 8192  }
   0x7   :  { %181 = vmatmul.msk.f32.vlgmr.msra.gmra.mxu1 %vm64_vm1, %v34_v7  ;;  %120 = vmatpush.msra.mxu2 %v99_v8  ;;  %v186_v15 = vld [vmem:[%s326_s4] ss:$0 sm:$0xff]  ;;  %s169_s19 = sshll.u32 %s214_s18, 4  ;;  %s170_s19 = int_to_ptr.vmem [resolvable:$true] %s169_s19 }
   0x8   :  { %v187_v20 = vld [vmem:[%s328_s6] ss:$0 sm:$0xff]  ;;  %s171_s6 = sshll.u32 %s331_s9, 4  ;;  %s172_s6 = int_to_ptr.hbm [resolvable:$true] %s171_s6 }
   0x9   :  { %121 = vmatpush.msra.mxu2 %v98_v9  ;;  %v131_v24 = vld [vmem:[%s329_s7] sm:$0x1] }
   0xb   :  { %122 = vmatpush.msra.mxu2 %v97_v10 }
   0xd   :  { %123 = vmatpush.msra.mxu2 %v96_v11 }
   0xf   :  { %124 = vmatpush.msra.mxu2 %v95_v12 }
  0x11   :  { %125 = vmatpush.msra.mxu2 %v94_v13 }
  0x80   :  { %v61_v14 = vpop.f32.mrf.mxu0 }
  0x84   :  { %v85_v16 = vpop.f32.mrf.mxu1 }
  0x85   :  { %v86_v17 = vadd.f32 %v85_v16, %v61_v14 }
  0x87   :  { %v92_v18 = vadd.f32 %v186_v15, %v86_v17 }
  0x89   :  { %v93_v19 = vmax.f32 %v92_v18, 0.0 }
  0x8b   :  { %182 = vmatmul.msk.f32.vlgmr.msra.gmra.mxu2 %vm106_vm2, %v93_v19 }
 0x10e   :  { %v127_v21 = vpop.f32.mrf.mxu2 }
 0x10f   :  { %v128_v22 = vadd.f32 %v187_v20, %v127_v21 }
 0x111   :  { %v130_v23 = vmax.f32 %v128_v22, 0.0 }
 0x113   :  { %183 = vmatpush.xpose.msk.msra.mxu3 %vm134_vm3, %v130_v23 }
 0x116   :  { %184 = vmatmul.msk.f32.vlgmr.msra.gmra.mxu3 %vm134_vm3, %v131_v24 }
 0x199   :  { %v158_v26 = vpop.f32.mrf.mxu3 }
 0x19a   :  { %v159_v27 = vadd.f32 %v158_v26, %v133_v25 }
 0x19c   :  { %v161_v28 = vmax.f32 %v159_v27, 0.0 }
 0x19e   :  { %163 = vst.msk [vmem:[#allocation3] sm:$0x1] %vm162_vm4, %v161_v28 }
 0x19f   :  { %174 = dma.vmem_to_hbm [thread:$0]  %s170_s19, 16, %s172_s6, [#allocation4]  }
 0x1a0   :  { %212 = dma.done.wait [#allocation4], 16  }
 0x1a1   :  { %213 = vsyncadd [#allocation4], 4294967280 }
 0x1a2   :  { %179 = vsyncpa [#allocation4], 1 }

</bundles_post_ra>
